<compile_context>
chip_gen: v6e
topology: v6e:2x2x1
jax: 0.10.0
libtpu: 0.0.40
codegen_flags: <defaults>
</compile_context>

<pallas_src>
import jax
import jax.numpy as jnp
from jax.experimental import pallas as pl
from jax.experimental.pallas import tpu as pltpu


def _mish_kernel(x_ref, o_ref):
    x = x_ref[...].astype(jnp.float32)
    # t = exp(-|x|) in (0, 1]: never overflows.
    t = jnp.exp(-jnp.abs(x))
    # tanh(softplus(x)) == (s - w) / (s + w), with s = (1 + t)^2 and
    #   w = t^2 (x >= 0)  |  w = 1 (x < 0)
    # -- exact rewrite of ((1+e^x)^2 - 1)/((1+e^x)^2 + 1) in terms of t.
    u = 1.0 + t
    s = u * u
    w = jnp.where(x >= 0.0, t * t, 1.0)
    num = s - w
    den = s + w                       # den in (1, 5]: well conditioned.
    # EUP approx reciprocal + one Newton step: ~1e-7 rel error, cheaper than a
    # full-precision divide and keeps the VPU chain short (matters on v7x).
    r = pl.reciprocal(den, approx=True)
    r = r * (2.0 - den * r)
    o_ref[...] = (x * num * r).astype(o_ref.dtype)


def _tpu_config():
    """Per-generation (target_block_bytes, vmem_limit_bytes, num_tensorcores)."""
    kind = ""
    try:
        kind = jax.devices()[0].device_kind.lower()
    except Exception:
        pass
    if "v7" in kind:
        # 64 MiB physical VMEM, ~3.2 TB/s HBM, 2 TensorCores per chip.
        return 4 * 1024 * 1024, 48 << 20, 2
    if "v6" in kind:
        # 128 MiB physical VMEM (32 MiB scoped default) -> raise explicitly.
        return 4 * 1024 * 1024, 64 << 20, 1
    if "v5" in kind:
        # 16 MiB scoped default -> keep 2 MiB blocks, modest explicit headroom.
        return 2 * 1024 * 1024, 32 << 20, 1
    # Unknown generation: conservative, same as the known-good baseline.
    return 2 * 1024 * 1024, None, 1


def _pick_block_rows(rows, width, block_bytes, compute_itemsize, row_align, num_tc):
    block_rows = max(1, block_bytes // (width * compute_itemsize))
    block_rows = min(rows, block_rows)
    if block_rows < rows:
        block_rows = max(row_align, (block_rows // row_align) * row_align)
    # v7x: make sure both TensorCores get work (even #blocks, >= 2) once the
    # tensor is big enough to be worth splitting.
    if num_tc >= 2 and rows * width * compute_itemsize >= (2 << 20):
        g = pl.cdiv(rows, block_rows)
        if g % 2 == 1:
            br = -(-rows // (g + 1))                       # ceil(rows / (g+1))
            br = max(row_align, -(-br // row_align) * row_align)
            if pl.cdiv(rows, br) % 2 == 0:
                block_rows = br
    return block_rows


def _largest_divisor_leq(n, cap):
    for c in range(min(n, cap), 0, -1):
        if n % c == 0:
            return c
    return 1


def _mish_2d(x2d, block_shape, grid, dim_sem, vmem_limit, cost):
    rows, cols = x2d.shape
    return pl.pallas_call(
        _mish_kernel,
        out_shape=jax.ShapeDtypeStruct((rows, cols), x2d.dtype),
        grid_spec=pltpu.PrefetchScalarGridSpec(
            num_scalar_prefetch=0,
            grid=grid,
            in_specs=[pl.BlockSpec(block_shape, lambda i: (i, 0))],
            out_specs=pl.BlockSpec(block_shape, lambda i: (i, 0)),
        ),
        compiler_params=pltpu.CompilerParams(
            dimension_semantics=dim_sem,
            vmem_limit_bytes=vmem_limit),
        cost_estimate=cost,
    )(x2d)


def mish_pallas(x: jax.Array, *, target_block_bytes: int | None = None) -> jax.Array:
    """Elementwise Mish. Any shape/dtype; computes in f32, returns x.dtype."""
    orig_shape = x.shape
    orig_dtype = x.dtype
    n = x.size
    if n == 0:
        return x

    block_bytes, vmem_limit, num_tc = _tpu_config()
    if target_block_bytes is not None:
        block_bytes = target_block_bytes

    itemsize = jnp.dtype(orig_dtype).itemsize
    compute_itemsize = max(4, itemsize)              # in-kernel f32 upcast
    row_align = 8 * (4 // min(4, itemsize))          # 8 (f32) / 16 (bf16) / 32 (8-bit)

    flat = jnp.ravel(x)                              # free metadata reshape
    cost = pl.CostEstimate(flops=12 * n, transcendentals=2 * n,
                           bytes_accessed=2 * n * itemsize)

    # --- Path A: lane-dense tiled streaming path (n divisible by 128). ------
    width = None
    for w in (1024, 512, 256, 128):
        if n % w == 0:
            width = w
            break
    if width is not None:
        rows = n // width
        block_rows = _pick_block_rows(rows, width, block_bytes,
                                      compute_itemsize, row_align, num_tc)
        out2d = _mish_2d(flat.reshape(rows, width), (block_rows, width),
                         (pl.cdiv(rows, block_rows),), ("parallel",),
                         vmem_limit, cost)
        return out2d.reshape(orig_shape)

    # --- Path B: irregular n, single full-array block (no pad / no slice). --
    cols = _largest_divisor_leq(n, 1024)
    rows = n // cols
    padded_bytes = (-(-rows // row_align) * row_align) * \
                   (-(-cols // 128) * 128) * compute_itemsize
    if padded_bytes <= block_bytes:
        out2d = _mish_2d(flat.reshape(rows, cols), (rows, cols),
                         (1,), ("arbitrary",), vmem_limit, cost)
        return out2d.reshape(orig_shape)

    # --- Path C: huge AND awkwardly factored (rare) -> minimal 128-pad. -----
    # TODO(synk): a fully copy-free path here would need manual ragged DMA.
    width = 128
    n_pad = -(-n // width) * width
    rows = n_pad // width
    block_rows = _pick_block_rows(rows, width, block_bytes,
                                  compute_itemsize, row_align, num_tc)
    x2d = jnp.pad(flat, (0, n_pad - n)).reshape(rows, width)
    out2d = _mish_2d(x2d, (block_rows, width),
                     (pl.cdiv(rows, block_rows),), ("parallel",),
                     vmem_limit, cost)
    return out2d.reshape(-1)[:n].reshape(orig_shape)


def mish_reference(x: jax.Array) -> jax.Array:
    xf = x.astype(jnp.float32)
    return (xf * jnp.tanh(jax.nn.softplus(xf))).astype(x.dtype)


if __name__ == "__main__":
    key = jax.random.PRNGKey(0)

    # NCHW, matching the PyTorch conv-activation convention.
    x = jax.random.normal(key, (2, 4, 16, 16), dtype=jnp.float32)
    y = mish_pallas(x)
    jax.block_until_ready(y)
    y_ref = mish_reference(x)
    assert y.shape == x.shape and y.dtype == x.dtype
    assert jnp.allclose(y, y_ref, atol=1e-5, rtol=1e-5)

    # Irregular element count: exercises the copy-free single-block path.
    x2 = jax.random.normal(jax.random.PRNGKey(1), (2, 3, 7, 5), dtype=jnp.float32)
    y2 = mish_pallas(x2)
    jax.block_until_ready(y2)
    assert jnp.allclose(y2, mish_reference(x2), atol=1e-5, rtol=1e-5)

    # Multi-block tiled path (small forced blocks to exercise the pipeline).
    x3 = jax.random.normal(jax.random.PRNGKey(2), (2, 4, 64, 64), dtype=jnp.float32)
    y3 = mish_pallas(x3, target_block_bytes=64 * 1024)
    jax.block_until_ready(y3)
    assert jnp.allclose(y3, mish_reference(x3), atol=1e-5, rtol=1e-5)

    # bf16 storage dtype (f32 compute inside the kernel).
    x4 = jax.random.normal(jax.random.PRNGKey(3), (2, 4, 16, 16), dtype=jnp.bfloat16)
    y4 = mish_pallas(x4)
    jax.block_until_ready(y4)
    assert y4.dtype == jnp.bfloat16
    assert jnp.allclose(y4.astype(jnp.float32),
                        mish_reference(x4).astype(jnp.float32),
                        atol=3e-2, rtol=3e-2)

    print("KERNEL_OK")
</pallas_src>

<mosaic_0001>
module attributes {stable_mosaic.version = 11 : i64} {
  func.func @_mish_kernel(%arg0: i32, %arg1: memref<2x1024xf32, #tpu.memory_space<vmem>>, %arg2: memref<2x1024xf32, #tpu.memory_space<vmem>>) attributes {dimension_semantics = [#tpu.dimension_semantics<parallel>], iteration_bounds = array<i64: 1>, scalar_prefetch = 0 : i64, scratch_operands = 0 : i64, tpu.core_type = #tpu.core_type<tc>, window_params = [{transform_indices = @transform_0, window_bounds = array<i64: 2, 1024>}, {transform_indices = @transform_1, window_bounds = array<i64: 2, 1024>}]} {
    %c0 = arith.constant 0 : index
    %c0_0 = arith.constant 0 : index
    %0 = vector.load %arg1[%c0, %c0_0] : memref<2x1024xf32, #tpu.memory_space<vmem>>, vector<2x1024xf32>
    %1 = math.absf %0 : vector<2x1024xf32>
    %cst = arith.constant 0.000000e+00 : f32
    %2 = vector.broadcast %cst : f32 to vector<2x1024xf32>
    %3 = arith.subf %2, %1 : vector<2x1024xf32>
    %4 = math.exp %3 : vector<2x1024xf32>
    %cst_1 = arith.constant 1.000000e+00 : f32
    %5 = vector.broadcast %cst_1 : f32 to vector<2x1024xf32>
    %6 = arith.addf %5, %4 : vector<2x1024xf32>
    %7 = arith.mulf %6, %6 : vector<2x1024xf32>
    %cst_2 = arith.constant 0.000000e+00 : f32
    %8 = vector.broadcast %cst_2 : f32 to vector<2x1024xf32>
    %9 = arith.cmpf oge, %0, %8 : vector<2x1024xf32>
    %10 = arith.mulf %4, %4 : vector<2x1024xf32>
    %cst_3 = arith.constant 1.000000e+00 : f32
    %11 = vector.broadcast %cst_3 : f32 to vector<2x1024xf32>
    %12 = arith.select %9, %10, %11 : vector<2x1024xi1>, vector<2x1024xf32>
    %13 = arith.subf %7, %12 : vector<2x1024xf32>
    %14 = arith.addf %7, %12 : vector<2x1024xf32>
    %15 = tpu.reciprocal %14 {approx = true} : vector<2x1024xf32> -> vector<2x1024xf32>
    %16 = arith.mulf %14, %15 : vector<2x1024xf32>
    %cst_4 = arith.constant 2.000000e+00 : f32
    %17 = vector.broadcast %cst_4 : f32 to vector<2x1024xf32>
    %18 = arith.subf %17, %16 : vector<2x1024xf32>
    %19 = arith.mulf %15, %18 : vector<2x1024xf32>
    %20 = arith.mulf %0, %13 : vector<2x1024xf32>
    %21 = arith.mulf %20, %19 : vector<2x1024xf32>
    %c0_5 = arith.constant 0 : index
    %c0_6 = arith.constant 0 : index
    %22 = vector.load %arg2[%c0_5, %c0_6] : memref<2x1024xf32, #tpu.memory_space<vmem>>, vector<2x1024xf32>
    tpu.vector_store %arg2[%c0_5, %c0_6], %21 {strides = array<i32>} : memref<2x1024xf32, #tpu.memory_space<vmem>>, vector<2x1024xf32>,
    return
  }
  func.func @transform_0(%arg0: i32) -> (i32, i32) {
    %c0_i32 = arith.constant 0 : i32
    %c0_i32_0 = arith.constant 0 : i32
    return %arg0, %c0_i32 : i32, i32
  }
  func.func @transform_1(%arg0: i32) -> (i32, i32) {
    %c0_i32 = arith.constant 0 : i32
    %c0_i32_0 = arith.constant 0 : i32
    return %arg0, %c0_i32 : i32, i32
  }
}

</mosaic_0001>

<bundles_post_ra>
// kernel: tpu_custom_call.1
= control target key start
LH: loop header
LB: loop body
LE: loop exit
PB: predicated region body
PF: predicated region fallthrough
CT: control target
= control target key end

     0   :  { %6 = vsyncpa [#allocation3], 0  ;;  %s146_s0 = inlined_call_operand.hbm [shape: f32[2,1024], index: 0, kind: input, shape index: {}]   ;;  %s147_s1 = inlined_call_operand.hbm [shape: f32[2,1024], index: 1, kind: output, shape index: {}]  }
   0x1   :  { %7 = vsyncpa [#allocation4], 0  ;;  %s128_s6 = smov [#allocation2]  }
   0x2   :  { %s14_s7 = sshll.u32 %s128_s6, 4  ;;  %s15_s7 = int_to_ptr.vmem [resolvable:$true] %s14_s7 }
   0x3   :  { %s92_s8 = scalar_lea.vmem %s15_s7, 256  ;;  %p97_p1 = scmp.lt.s32.totalorder %s15_s7, %s15_s7 }
   0x4   :  { %p93_p0 = scmp.ne.s32.totalorder %s15_s7, %s92_s8  ;;  %p98_p2 = scmp.lt.s32.totalorder %s92_s8, %s92_s8 }
   0x6   :  { %p99_p3 = por %p98_p2, %p97_p1 }
   0x8   :  { %p100_p4 = pnand %p99_p3, %p93_p0 }
   0xa   :  { %103 = shalt.err (!%p100_p4)
}
   0xb   :  { %17 = dma.hbm_to_vmem [thread:$0]  %s146_s0, 256, %s15_s7, [#allocation3]  }
   0xc   :  { %124 = dma.done.wait [#allocation3], 256  }
   0xd   :  { %125 = vsyncadd [#allocation3], 4294967040  ;;  %v21_v0 = vld [vmem:[#allocation2] sm:$0xff]  ;;  %v22_v1 = vld [vmem:[#allocation2 + $0x8] sm:$0xff]  ;;  %s129_s0 = smov [#allocation5]  }
   0xe   :  { %v23_v2 = vand.u32 2147483647, %v21_v0  ;;  %v24_v3 = vand.u32 2147483647, %v22_v1  ;;  %vm35_vm0 = vcmp.ge.f32.partialorder %v21_v0, 0.0  ;;  %vm36_vm1 = vcmp.ge.f32.partialorder %v22_v1, 0.0 }
   0xf   :  { %s65_s11 = sshll.u32 %s129_s0, 4  ;;  %s66_s11 = int_to_ptr.vmem [resolvable:$true] %s65_s11 }
  0x10   :  { %v25_v4 = vsub.f32 0.0, %v23_v2  ;;  %v26_v5 = vsub.f32 0.0, %v24_v3  ;;  %s104_s12 = scalar_lea.vmem %s66_s11, 256  ;;  %p109_p6 = scmp.lt.s32.totalorder %s66_s11, %s66_s11 }
  0x11   :  { %p105_p5 = scmp.ne.s32.totalorder %s66_s11, %s104_s12  ;;  %p110_p7 = scmp.lt.s32.totalorder %s104_s12, %s104_s12 }
  0x12   :  { %v27_v6 = vmul.f32 1.442695, %v25_v4  ;;  %v29_v7 = vmul.f32 1.442695, %v26_v5 }
  0x13   :  { %p111_p8 = por %p110_p7, %p109_p6 }
  0x14   :  { %76 = vpow2.f32 %v27_v6 }
  0x15   :  { %78 = vpow2.f32 %v29_v7  ;;  %p112_p9 = pnand %p111_p8, %p105_p5 }
  0x21   :  { %v77_v8 = vpop.eup %76 }
  0x22   :  { %v79_v9 = vpop.eup %78  ;;  %v31_v10 = vadd.f32 1.0, %v77_v8  ;;  %v37_v11 = vmul.f32 %v77_v8, %v77_v8 }
  0x23   :  { %v32_v12 = vadd.f32 1.0, %v79_v9  ;;  %v38_v13 = vmul.f32 %v79_v9, %v79_v9 }
  0x24   :  { %v33_v14 = vmul.f32 %v31_v10, %v31_v10  ;;  %v39_v15 = vsel %vm35_vm0, %v37_v11, 1.0 }
  0x25   :  { %v34_v16 = vmul.f32 %v32_v12, %v32_v12  ;;  %v40_v17 = vsel %vm36_vm1, %v38_v13, 1.0 }
  0x26   :  { %v43_v18 = vadd.f32 %v39_v15, %v33_v14  ;;  %v41_v20 = vsub.f32 %v33_v14, %v39_v15 }
  0x27   :  { %v44_v19 = vadd.f32 %v40_v17, %v34_v16  ;;  %v42_v22 = vsub.f32 %v34_v16, %v40_v17 }
  0x28   :  { %80 = vrcp.f32 %v43_v18  ;;  %v53_v27 = vmul.f32 %v41_v20, %v21_v0 }
  0x29   :  { %82 = vrcp.f32 %v44_v19  ;;  %v54_v29 = vmul.f32 %v42_v22, %v22_v1 }
  0x35   :  { %v81_v21 = vpop.eup %80 }
  0x36   :  { %v83_v23 = vpop.eup %82  ;;  %v47_v24 = vmul.f32 %v81_v21, %v43_v18 }
  0x37   :  { %v48_v25 = vmul.f32 %v83_v23, %v44_v19 }
  0x38   :  { %v49_v26 = vsub.f32 2.0, %v47_v24 }
  0x39   :  { %v50_v28 = vsub.f32 2.0, %v48_v25 }
  0x3a   :  { %v51_v30 = vmul.f32 %v81_v21, %v49_v26 }
  0x3b   :  { %v52_v31 = vmul.f32 %v83_v23, %v50_v28 }
  0x3c   :  { %v55_v32 = vmul.f32 %v53_v27, %v51_v30 }
  0x3d   :  { %v56_v33 = vmul.f32 %v54_v29, %v52_v31 }
  0x3e   :  { %57 = vst [vmem:[#allocation5] sm:$0xff] %v55_v32 }
  0x3f   :  { %58 = vst [vmem:[#allocation5 + $0x8] sm:$0xff] %v56_v33 }
  0x40   :  { %115 = shalt.err (!%p112_p9)
}
  0x41   :  { %68 = dma.vmem_to_hbm [thread:$0]  %s66_s11, 256, %s147_s1, [#allocation4]  }
  0x42   :  { %126 = dma.done.wait [#allocation4], 256  }
  0x43   :  { %127 = vsyncadd [#allocation4], 4294967040 }
  0x44   :  { %72 = vsyncpa [#allocation3], 1 }
  0x45   :  { %73 = vsyncpa [#allocation4], 1 }

</bundles_post_ra>
